<compile_context>
chip_gen: v7x
topology: tpu7x:2x2x1
jax: 0.10.0
libtpu: 0.0.40
codegen_flags: <defaults>
</compile_context>

<pallas_src>
import functools

import numpy as np
import jax
import jax.numpy as jnp
from jax.experimental import pallas as pl
from jax.experimental.pallas import tpu as pltpu


# ----------------------------------------------------------------------------
# Deterministic parameter init (mirrors Communication.init_gaussian_filter)
# ----------------------------------------------------------------------------
K_SIZE = 5
C_SIGMA = 1.0
THRESHOLD = 0.6


def _gauss_1d(k_size=K_SIZE, sigma=C_SIGMA, normalize=False):
    center = k_size // 2
    d = np.arange(k_size, dtype=np.float64) - center
    g = np.exp(-np.square(d) / (2.0 * np.square(sigma)))
    if normalize:
        g = g / (2.0 * np.pi * sigma)
    return g.astype(np.float32)


def _gaussian_kernel_2d(k_size=K_SIZE, sigma=C_SIGMA):
    # Exact outer product of the 1-D factors used by the kernel's separable
    # Toeplitz matmuls (identical to 1/(2*pi*sigma)*exp(-(x^2+y^2)/(2*sigma^2))).
    gv = _gauss_1d(k_size, sigma, normalize=True)
    gh = _gauss_1d(k_size, sigma, normalize=False)
    return np.outer(gv, gh).astype(np.float32)


def _toeplitz(n, g1d):
    """Banded Toeplitz T with T[i, i+off] = g1d[off + pad] ("same" zero-pad conv)."""
    k = g1d.shape[0]
    pad = (k - 1) // 2
    t_mat = np.zeros((n, n), np.float32)
    for t in range(k):
        off = t - pad
        idx = np.arange(max(0, -off), min(n, n - off))
        t_mat[idx, idx + off] = g1d[t]
    return t_mat


# ----------------------------------------------------------------------------
# Pallas kernel: the whole problem in one grid step.
#   sigmoid(max over C) -> batched separable gaussian smoothing (two MXU
#   matmuls against Toeplitz / block-diag Toeplitz constants) -> threshold ->
#   mask, ego mask, communication rate, ego override.
# ----------------------------------------------------------------------------
def _comm_kernel(tv_ref, thbd_ref, first_ref, wrate_ref, x_ref,
                 mask_ref, ego_ref, rate_ref, *, threshold, w):
    x = x_ref[...]                                                   # (C, H, LW)
    # channel max first (leading-axis VPU max on lane-dense vregs), sigmoid once.
    conf = jax.nn.sigmoid(jnp.max(x, axis=0).astype(jnp.float32))    # (H, LW)

    # batched "SAME" separable gaussian conv: two MXU matmuls for ALL agents.
    tmp = jnp.dot(tv_ref[...], conf, preferred_element_type=jnp.float32)
    smoothed = jnp.dot(tmp, thbd_ref[...], preferred_element_type=jnp.float32)

    mask_pre = (smoothed > threshold).astype(mask_ref.dtype)         # (H, LW)

    # ego = pre-override mask of batch 0 / agent 0 (first W lanes).
    ego_ref[...] = mask_pre[:, :w]

    # communication rate (pre-override); per-batch 1/(L_b*H*W*B) baked in wrate.
    rate_ref[...] = jnp.sum(mask_pre.astype(jnp.float32) * wrate_ref[...],
                            keepdims=True)

    # ego override: first agent of every batch element -> all ones.
    mask_ref[...] = jnp.maximum(mask_pre, first_ref[...].astype(mask_ref.dtype))


# ----------------------------------------------------------------------------
# Module-level forward (single kernel launch + wrapper-side layout plumbing)
# ----------------------------------------------------------------------------
def communication_forward(batch_confidence_maps, threshold=THRESHOLD):
    """batch_confidence_maps: list of (L_b, C, H, W) arrays."""
    B = len(batch_confidence_maps)
    Ls = [int(m.shape[0]) for m in batch_confidence_maps]
    _, C, H, W = batch_confidence_maps[0].shape
    L_total = sum(Ls)
    LW = L_total * W
    dtype = batch_confidence_maps[0].dtype

    # Lane-dense packing: each (L_b,C,H,W) -> (C,H,L_b*W), concat along lanes.
    # TODO(synk): callers holding an already-packed (C,H,L_total*W) tensor can
    # skip this copy entirely.
    x_wide = jnp.concatenate(
        [jnp.transpose(m, (1, 2, 0, 3)).reshape(C, H, Ls[b] * W)
         for b, m in enumerate(batch_confidence_maps)], axis=-1)      # (C,H,LW)

    # Host-built constants: separable Toeplitz factors, block-diag horizontal.
    gv = _gauss_1d(K_SIZE, C_SIGMA, normalize=True)
    gh = _gauss_1d(K_SIZE, C_SIGMA, normalize=False)
    tv = jnp.asarray(_toeplitz(H, gv))                                # (H,H) left
    th = _toeplitz(W, gh).T                                           # (W,W) right
    thbd = jnp.asarray(np.kron(np.eye(L_total, dtype=np.float32), th))  # (LW,LW)

    # Per-lane constants: first-agent indicator + rate weights.
    first_row = np.zeros((1, LW), np.float32)
    wrate_row = np.zeros((1, LW), np.float32)
    off = 0
    for b, L in enumerate(Ls):
        first_row[0, off * W:(off + 1) * W] = 1.0
        wrate_row[0, off * W:(off + L) * W] = 1.0 / (L * H * W * B)
        off += L
    first_row = jnp.asarray(first_row)
    wrate_row = jnp.asarray(wrate_row)

    kernel = functools.partial(_comm_kernel, threshold=float(threshold), w=W)
    mask_wide, ego_wide, rate = pl.pallas_call(
        kernel,
        out_shape=(
            jax.ShapeDtypeStruct((H, LW), dtype),
            jax.ShapeDtypeStruct((H, W), dtype),
            jax.ShapeDtypeStruct((1, 1), jnp.float32),
        ),
        grid_spec=pltpu.PrefetchScalarGridSpec(
            num_scalar_prefetch=0,
            grid=(1,),
            in_specs=[
                pl.BlockSpec((H, H), lambda i: (0, 0)),
                pl.BlockSpec((LW, LW), lambda i: (0, 0)),
                pl.BlockSpec((1, LW), lambda i: (0, 0)),
                pl.BlockSpec((1, LW), lambda i: (0, 0)),
                pl.BlockSpec((C, H, LW), lambda i: (0, 0, 0)),
            ],
            out_specs=[
                pl.BlockSpec((H, LW), lambda i: (0, 0)),
                pl.BlockSpec((H, W), lambda i: (0, 0)),
                pl.BlockSpec((1, 1), lambda i: (0, 0)),
            ],
        ),
        compiler_params=pltpu.CompilerParams(
            dimension_semantics=("arbitrary",)),
    )(tv, thbd, first_row, wrate_row, x_wide)

    # Wrapper-side layout plumbing back to (L_total, 1, H, W).
    communication_masks = jnp.transpose(
        mask_wide.reshape(H, L_total, W), (1, 0, 2))[:, None]
    ego_comm_mask = ego_wide[None, None]                              # (1,1,H,W)
    communication_rates = rate[0, 0]
    return communication_masks, communication_rates, ego_comm_mask


# ----------------------------------------------------------------------------
# Pure-JAX reference (independent path: XLA conv on the 2-D filter)
# ----------------------------------------------------------------------------
def _reference_forward(batch_confidence_maps, threshold=THRESHOLD):
    B = len(batch_confidence_maps)
    w = jnp.asarray(_gaussian_kernel_2d(K_SIZE, C_SIGMA))[None, None]   # (1,1,k,k)
    masks, rates, smooths, ego = [], [], [], None
    for b in range(B):
        x = batch_confidence_maps[b]
        L, _, H, W = x.shape
        conf = jnp.max(jax.nn.sigmoid(x), axis=1, keepdims=True)        # (L,1,H,W)
        sm = jax.lax.conv_general_dilated(
            conf.astype(jnp.float32), w, (1, 1), "SAME",
            dimension_numbers=("NCHW", "OIHW", "NCHW"))
        mask = jnp.where(sm > threshold, 1.0, 0.0).astype(x.dtype)
        rates.append(jnp.sum(mask) / (L * H * W))
        if b == 0:
            ego = mask[0:1]
        mask = mask.at[0].set(1.0)
        masks.append(mask)
        smooths.append(sm)
    return (jnp.concatenate(masks, 0), sum(rates) / B, ego,
            jnp.concatenate(smooths, 0))


if __name__ == "__main__":
    key = jax.random.PRNGKey(0)
    k1, k2 = jax.random.split(key)
    # B = 2 batch elements with different numbers of agents L
    batch_confidence_maps = [
        jax.random.normal(k1, (3, 4, 16, 16), dtype=jnp.float32),
        jax.random.normal(k2, (2, 4, 16, 16), dtype=jnp.float32),
    ]

    masks, rate, ego_mask = communication_forward(batch_confidence_maps)
    masks = jax.block_until_ready(masks)
    rate = jax.block_until_ready(rate)
    ego_mask = jax.block_until_ready(ego_mask)

    ref_masks, ref_rate, ref_ego, ref_smooth = _reference_forward(
        batch_confidence_maps)
    ref_masks = np.asarray(ref_masks)
    ref_ego = np.asarray(ref_ego)
    ref_rate = float(ref_rate)
    ref_smooth = np.asarray(ref_smooth)                               # (L,1,H,W)

    # Tie-robust comparison: the separable-Toeplitz accumulation order differs
    # from the XLA conv reference, so values numerically ON the threshold may
    # flip a bit; exclude those positions and bound their effect on the rate.
    safe = np.abs(ref_smooth - THRESHOLD) > 1e-4

    np.testing.assert_array_equal(np.asarray(masks)[safe], ref_masks[safe])
    np.testing.assert_array_equal(np.asarray(ego_mask)[safe[:1]],
                                  ref_ego[safe[:1]])

    Ls = [int(m.shape[0]) for m in batch_confidence_maps]
    B = len(Ls)
    H, W = batch_confidence_maps[0].shape[2:]
    w_agent = np.concatenate(
        [np.full((L,), 1.0 / (L * H * W * B), np.float32) for L in Ls])
    w_full = np.broadcast_to(w_agent[:, None, None, None], ref_smooth.shape)
    rate_tol = float(np.sum(w_full[~safe])) + 1e-5
    np.testing.assert_allclose(float(rate), ref_rate, rtol=0, atol=rate_tol)

    print("KERNEL_OK")
</pallas_src>

<mosaic_0001>
module attributes {stable_mosaic.version = 11 : i64} {
  func.func @_comm_kernel(%arg0: i32, %arg1: memref<16x16xf32, #tpu.memory_space<vmem>>, %arg2: memref<80x80xf32, #tpu.memory_space<vmem>>, %arg3: memref<1x80xf32, #tpu.memory_space<vmem>>, %arg4: memref<1x80xf32, #tpu.memory_space<vmem>>, %arg5: memref<4x16x80xf32, #tpu.memory_space<vmem>>, %arg6: memref<16x80xf32, #tpu.memory_space<vmem>>, %arg7: memref<16x16xf32, #tpu.memory_space<vmem>>, %arg8: memref<1x1xf32, #tpu.memory_space<vmem>>) attributes {dimension_semantics = [#tpu.dimension_semantics<arbitrary>], iteration_bounds = array<i64: 1>, scalar_prefetch = 0 : i64, scratch_operands = 0 : i64, tpu.core_type = #tpu.core_type<tc>, window_params = [{pipeline_mode = #tpu.pipeline_mode<synchronous>, transform_indices = @transform_0, window_bounds = array<i64: 16, 16>}, {pipeline_mode = #tpu.pipeline_mode<synchronous>, transform_indices = @transform_1, window_bounds = array<i64: 80, 80>}, {pipeline_mode = #tpu.pipeline_mode<synchronous>, transform_indices = @transform_2, window_bounds = array<i64: 1, 80>}, {pipeline_mode = #tpu.pipeline_mode<synchronous>, transform_indices = @transform_3, window_bounds = array<i64: 1, 80>}, {pipeline_mode = #tpu.pipeline_mode<synchronous>, transform_indices = @transform_4, window_bounds = array<i64: 4, 16, 80>}, {pipeline_mode = #tpu.pipeline_mode<synchronous>, transform_indices = @transform_5, window_bounds = array<i64: 16, 80>}, {pipeline_mode = #tpu.pipeline_mode<synchronous>, transform_indices = @transform_6, window_bounds = array<i64: 16, 16>}, {pipeline_mode = #tpu.pipeline_mode<synchronous>, transform_indices = @transform_7, window_bounds = array<i64: 1, 1>}]} {
    %c0 = arith.constant 0 : index
    %c0_0 = arith.constant 0 : index
    %c0_1 = arith.constant 0 : index
    %0 = vector.load %arg5[%c0, %c0_0, %c0_1] : memref<4x16x80xf32, #tpu.memory_space<vmem>>, vector<4x16x80xf32>
    %cst = arith.constant dense<0xFF800000> : vector<16x80xf32>
    %1 = vector.multi_reduction <maximumf>, %0, %cst [0] : vector<4x16x80xf32> to vector<16x80xf32>
    %2 = arith.negf %1 : vector<16x80xf32>
    %3 = math.exp %2 : vector<16x80xf32>
    %cst_2 = arith.constant 1.000000e+00 : f32
    %4 = vector.broadcast %cst_2 : f32 to vector<16x80xf32>
    %5 = arith.addf %4, %3 : vector<16x80xf32>
    %6 = arith.divf %4, %5 : vector<16x80xf32>
    %c0_3 = arith.constant 0 : index
    %c0_4 = arith.constant 0 : index
    %7 = vector.load %arg1[%c0_3, %c0_4] : memref<16x16xf32, #tpu.memory_space<vmem>>, vector<16x16xf32>
    %cst_5 = arith.constant dense<0.000000e+00> : vector<16x80xf32>
    %8 = tpu.matmul %7, %6, %cst_5 {dimension_numbers = #tpu.dot_dimension_numbers<[1], [0], [0], [1], [0, 0, 1, 1], [], []>} : vector<16x16xf32>, vector<16x80xf32>, vector<16x80xf32> -> vector<16x80xf32>
    %c0_6 = arith.constant 0 : index
    %c0_7 = arith.constant 0 : index
    %9 = vector.load %arg2[%c0_6, %c0_7] : memref<80x80xf32, #tpu.memory_space<vmem>>, vector<80x80xf32>
    %cst_8 = arith.constant dense<0.000000e+00> : vector<16x80xf32>
    %10 = tpu.matmul %8, %9, %cst_8 {dimension_numbers = #tpu.dot_dimension_numbers<[1], [0], [0], [1], [0, 0, 1, 1], [], []>} : vector<16x80xf32>, vector<80x80xf32>, vector<16x80xf32> -> vector<16x80xf32>
    %cst_9 = arith.constant 6.000000e-01 : f32
    %11 = vector.broadcast %cst_9 : f32 to vector<16x80xf32>
    %12 = arith.cmpf ogt, %10, %11 : vector<16x80xf32>
    %13 = arith.extui %12 : vector<16x80xi1> to vector<16x80xi32>
    %14 = arith.sitofp %13 : vector<16x80xi32> to vector<16x80xf32>
    %15 = vector.extract_strided_slice %14 {offsets = [0, 0], sizes = [16, 16], strides = [1, 1]} : vector<16x80xf32> to vector<16x16xf32>
    %c0_10 = arith.constant 0 : index
    %c0_11 = arith.constant 0 : index
    %16 = vector.load %arg7[%c0_10, %c0_11] : memref<16x16xf32, #tpu.memory_space<vmem>>, vector<16x16xf32>
    tpu.vector_store %arg7[%c0_10, %c0_11], %15 {strides = array<i32>} : memref<16x16xf32, #tpu.memory_space<vmem>>, vector<16x16xf32>,
    %c0_12 = arith.constant 0 : index
    %c0_13 = arith.constant 0 : index
    %17 = vector.load %arg4[%c0_12, %c0_13] : memref<1x80xf32, #tpu.memory_space<vmem>>, vector<1x80xf32>
    %18 = vector.broadcast %17 : vector<1x80xf32> to vector<16x80xf32>
    %19 = arith.mulf %14, %18 : vector<16x80xf32>
    %20 = vector.shape_cast %19 : vector<16x80xf32> to vector<1x16x80xf32>
    %cst_14 = arith.constant dense<0.000000e+00> : vector<1xf32>
    %21 = vector.multi_reduction <add>, %20, %cst_14 [1, 2] : vector<1x16x80xf32> to vector<1xf32>
    %22 = vector.shape_cast %21 : vector<1xf32> to vector<1x1x1xf32>
    %23 = vector.extract %22[0, 0, 0] : f32 from vector<1x1x1xf32>
    %24 = vector.broadcast %23 : f32 to vector<1x1xf32>
    %c0_15 = arith.constant 0 : index
    %c0_16 = arith.constant 0 : index
    %25 = vector.load %arg8[%c0_15, %c0_16] : memref<1x1xf32, #tpu.memory_space<vmem>>, vector<1x1xf32>
    tpu.vector_store %arg8[%c0_15, %c0_16], %24 {strides = array<i32>} : memref<1x1xf32, #tpu.memory_space<vmem>>, vector<1x1xf32>,
    %c0_17 = arith.constant 0 : index
    %c0_18 = arith.constant 0 : index
    %26 = vector.load %arg3[%c0_17, %c0_18] : memref<1x80xf32, #tpu.memory_space<vmem>>, vector<1x80xf32>
    %27 = vector.broadcast %26 : vector<1x80xf32> to vector<16x80xf32>
    %28 = arith.maximumf %14, %27 : vector<16x80xf32>
    %c0_19 = arith.constant 0 : index
    %c0_20 = arith.constant 0 : index
    %29 = vector.load %arg6[%c0_19, %c0_20] : memref<16x80xf32, #tpu.memory_space<vmem>>, vector<16x80xf32>
    tpu.vector_store %arg6[%c0_19, %c0_20], %28 {strides = array<i32>} : memref<16x80xf32, #tpu.memory_space<vmem>>, vector<16x80xf32>,
    return
  }
  func.func @transform_0(%arg0: i32) -> (i32, i32) {
    %c0_i32 = arith.constant 0 : i32
    %c0_i32_0 = arith.constant 0 : i32
    %c0_i32_1 = arith.constant 0 : i32
    return %c0_i32, %c0_i32_0 : i32, i32
  }
  func.func @transform_1(%arg0: i32) -> (i32, i32) {
    %c0_i32 = arith.constant 0 : i32
    %c0_i32_0 = arith.constant 0 : i32
    %c0_i32_1 = arith.constant 0 : i32
    return %c0_i32, %c0_i32_0 : i32, i32
  }
  func.func @transform_2(%arg0: i32) -> (i32, i32) {
    %c0_i32 = arith.constant 0 : i32
    %c0_i32_0 = arith.constant 0 : i32
    %c0_i32_1 = arith.constant 0 : i32
    return %c0_i32, %c0_i32_0 : i32, i32
  }
  func.func @transform_3(%arg0: i32) -> (i32, i32) {
    %c0_i32 = arith.constant 0 : i32
    %c0_i32_0 = arith.constant 0 : i32
    %c0_i32_1 = arith.constant 0 : i32
    return %c0_i32, %c0_i32_0 : i32, i32
  }
  func.func @transform_4(%arg0: i32) -> (i32, i32, i32) {
    %c0_i32 = arith.constant 0 : i32
    %c0_i32_0 = arith.constant 0 : i32
    %c0_i32_1 = arith.constant 0 : i32
    %c0_i32_2 = arith.constant 0 : i32
    return %c0_i32, %c0_i32_0, %c0_i32_1 : i32, i32, i32
  }
  func.func @transform_5(%arg0: i32) -> (i32, i32) {
    %c0_i32 = arith.constant 0 : i32
    %c0_i32_0 = arith.constant 0 : i32
    %c0_i32_1 = arith.constant 0 : i32
    return %c0_i32, %c0_i32_0 : i32, i32
  }
  func.func @transform_6(%arg0: i32) -> (i32, i32) {
    %c0_i32 = arith.constant 0 : i32
    %c0_i32_0 = arith.constant 0 : i32
    %c0_i32_1 = arith.constant 0 : i32
    return %c0_i32, %c0_i32_0 : i32, i32
  }
  func.func @transform_7(%arg0: i32) -> (i32, i32) {
    %c0_i32 = arith.constant 0 : i32
    %c0_i32_0 = arith.constant 0 : i32
    %c0_i32_1 = arith.constant 0 : i32
    return %c0_i32, %c0_i32_0 : i32, i32
  }
}

</mosaic_0001>

<bundles_post_ra>
// kernel: tpu_custom_call.1
= control target key start
LH: loop header
LB: loop body
LE: loop exit
PB: predicated region body
PF: predicated region fallthrough
CT: control target
= control target key end

     0   :  { %13 = vsyncpa [#allocation3], 0  ;;  %s772_s0 = inlined_call_operand.hbm [shape: f32[16,16], index: 0, kind: input, shape index: {}]   ;;  %s773_s1 = inlined_call_operand.hbm [shape: f32[80,80], index: 1, kind: input, shape index: {}]   ;;  %s774_s2 = inlined_call_operand.vmem [shape: f32[1,80], index: 2, kind: input, shape index: {}]   ;;  %s775_s3 = inlined_call_operand.vmem [shape: f32[1,80], index: 3, kind: input, shape index: {}]   ;;  %s776_s4 = inlined_call_operand.hbm [shape: f32[4,16,80], index: 4, kind: input, shape index: {}]   ;;  %s777_s5 = inlined_call_operand.hbm [shape: f32[16,80], index: 5, kind: output, shape index: {0}]   ;;  %s778_s6 = inlined_call_operand.hbm [shape: f32[16,16], index: 6, kind: output, shape index: {1}]   ;;  %s779_s7 = inlined_call_operand.hbm [shape: f32[1,1], index: 7, kind: output, shape index: {2}]  }
   0x1   :  { %14 = vsyncpa [#allocation6], 0 }
   0x2   :  { %15 = vsyncpa [#allocation4], 0 }
   0x3   :  { %16 = vsyncpa [#allocation10], 0  ;;  %s605_s24 = smov [#allocation5]   ;;  %s606_s26 = smov [#allocation2]  }
   0x4   :  { %s34_s25 = sshll.u32 %s605_s24, 4  ;;  %s22_s27 = sshll.u32 %s606_s26, 4  ;;  %s35_s25 = int_to_ptr.vmem [resolvable:$true] %s34_s25  ;;  %s654_s27 = int_to_ptr.vmem [resolvable:$true] %s22_s27 }
   0x5   :  { %s465_s30 = scalar_lea.hbm %s773_s1, 1280 }
   0x6   :  { %p466_p0 = scmp.ne.s32.totalorder %s773_s1, %s465_s30  ;;  %p469_p1 = scmp.lt.u32.totalorder %s465_s30, %s773_s1 }
   0x8   :  { %p471_p2 = pnand %p469_p1, %p466_p0 }
   0xa   :  { %474 = shalt.err (!%p471_p2)
}
   0xb   :  { %s475_s12 = scalar_lea.vmem %s35_s25, 1280  ;;  %p480_p4 = scmp.lt.s32.totalorder %s35_s25, %s35_s25 }
   0xc   :  { %p476_p3 = scmp.ne.s32.totalorder %s35_s25, %s475_s12  ;;  %p481_p5 = scmp.lt.s32.totalorder %s475_s12, %s475_s12 }
   0xe   :  { %p482_p6 = por %p481_p5, %p480_p4 }
  0x10   :  { %p483_p7 = pnand %p482_p6, %p476_p3 }
  0x12   :  { %486 = shalt.err (!%p483_p7)
}
  0x13   :  { %s607_s13 = smov 128   ;;  %s608_s14 = smov 8  }
  0x14   :  { %40 = dma.hbm_to_vmem [thread:$0]  %s773_s1, 1280, %s35_s25, [#allocation6], %s607_s13, %s607_s13, %s608_s14  }
  0x15   :  { %s487_s19 = scalar_lea.hbm %s772_s0, 256 }
  0x16   :  { %p488_p8 = scmp.ne.s32.totalorder %s772_s0, %s487_s19  ;;  %p491_p9 = scmp.lt.u32.totalorder %s487_s19, %s772_s0 }
  0x18   :  { %p493_p10 = pnand %p491_p9, %p488_p8 }
  0x1a   :  { %496 = shalt.err (!%p493_p10)
}
  0x1b   :  { %s497_s24 = scalar_lea.vmem %s654_s27, 256  ;;  %p502_p12 = scmp.lt.s32.totalorder %s654_s27, %s654_s27 }
  0x1c   :  { %p498_p11 = scmp.ne.s32.totalorder %s654_s27, %s497_s24  ;;  %p503_p13 = scmp.lt.s32.totalorder %s497_s24, %s497_s24 }
  0x1e   :  { %p504_p0 = por %p503_p13, %p502_p12 }
  0x20   :  { %p505_p1 = pnand %p504_p0, %p498_p11 }
  0x22   :  { %508 = shalt.err (!%p505_p1)
}
  0x23   :  { %28 = dma.hbm_to_vmem [thread:$0]  %s772_s0, 256, %s654_s27, [#allocation3], %s607_s13, %s607_s13, %s608_s14  }
  0x24   :  { %s609_s26 = smov [#allocation7]   ;;  %s509_s8 = scalar_lea.hbm %s776_s4, 1024 }
  0x25   :  { %s50_s28 = sshll.u32 %s609_s26, 4  ;;  %p510_p2 = scmp.ne.s32.totalorder %s776_s4, %s509_s8  ;;  %s51_s28 = int_to_ptr.vmem [resolvable:$true] %s50_s28 }
  0x26   :  { %p513_p3 = scmp.lt.u32.totalorder %s509_s8, %s776_s4 }
  0x28   :  { %p515_p4 = pnand %p513_p3, %p510_p2 }
  0x2a   :  { %518 = shalt.err (!%p515_p4)
}
  0x2b   :  { %s519_s15 = scalar_lea.vmem %s51_s28, 1024  ;;  %p524_p6 = scmp.lt.s32.totalorder %s51_s28, %s51_s28 }
  0x2c   :  { %p520_p5 = scmp.ne.s32.totalorder %s51_s28, %s519_s15  ;;  %p525_p7 = scmp.lt.s32.totalorder %s519_s15, %s519_s15 }
  0x2e   :  { %p526_p8 = por %p525_p7, %p524_p6 }
  0x30   :  { %p527_p9 = pnand %p526_p8, %p520_p5 }
  0x32   :  { %530 = shalt.err (!%p527_p9)
}
  0x33   :  { %56 = dma.hbm_to_vmem [thread:$0]  %s776_s4, 1024, %s51_s28, [#allocation6], %s607_s13, %s607_s13, %s608_s14  }
  0x34   :  { %597 = dma.done.wait [#allocation3], 256  }
  0x35   :  { %598 = vsyncadd [#allocation3], 4294967040 }
  0x36   :  { %599 = dma.done.wait [#allocation6], 2304  }
  0x37   :  { %600 = vsyncadd [#allocation6], 4294964992  ;;  %vm74_vm0 = vcmask 654336   ;;  %v66_v0 = vld [vmem:[#allocation7] sm:$0xff]  ;;  %v67_v1 = vld [vmem:[#allocation7 + $0x8] sm:$0xff]  ;;  %vm103_vm1 = vcmask 130048  }
  0x38   :  { %v68_v2 = vld [vmem:[#allocation7 + $0x10] sm:$0xff]  ;;  %v69_v3 = vld [vmem:[#allocation7 + $0x18] sm:$0xff]  ;;  %v70_v4 = vld [vmem:[#allocation7 + $0x20] sm:$0xff]  ;;  %v75_v6 = vsel %vm74_vm0, %v66_v0, -inf  ;;  %v82_v8 = vsel %vm74_vm0, %v67_v1, -inf  ;;  %v610_v54 = vmov 0.0  }
  0x39   :  { %v71_v5 = vld [vmem:[#allocation7 + $0x28] sm:$0xff]  ;;  %v76_v7 = vsel %vm74_vm0, %v68_v2, -inf  ;;  %v72_v9 = vld [vmem:[#allocation7 + $0x30] sm:$0xff]  ;;  %v73_v10 = vld [vmem:[#allocation7 + $0x38] sm:$0xff]  ;;  %v77_v11 = vsel %vm74_vm0, %v70_v4, -inf  ;;  %v83_v12 = vsel %vm74_vm0, %v69_v3, -inf }
  0x3a   :  { %v84_v13 = vsel %vm74_vm0, %v71_v5, -inf  ;;  %v101_v14 = vld [vmem:[#allocation2] sm:$0xff]  ;;  %v78_v15 = vmax.f32 %v75_v6, %v77_v11  ;;  %v79_v16 = vsel %vm74_vm0, %v72_v9, -inf  ;;  %v86_v18 = vsel %vm74_vm0, %v73_v10, -inf  ;;  %v185_v19 = vld [vmem:[#allocation5] sm:$0xff]  ;;  %v186_v20 = vld [vmem:[#allocation5 + $0x8] sm:$0xff] }
  0x3b   :  { %v85_v17 = vmax.f32 %v82_v8, %v84_v13  ;;  %396 = vmatprep.mubr.msk.f32.mxu0 %vm103_vm1, %v101_v14  ;;  %v80_v21 = vmax.f32 %v76_v7, %v79_v16  ;;  %v87_v22 = vmax.f32 %v83_v12, %v86_v18  ;;  %v426_v23 = vpack.c.bf16 %v186_v20, %v185_v19  ;;  %v187_v24 = vld [vmem:[#allocation5 + $0x10] sm:$0xff]  ;;  %v188_v25 = vld [vmem:[#allocation5 + $0x18] sm:$0xff]  ;;  %v189_v27 = vld [vmem:[#allocation5 + $0x20] sm:$0xff]  ;;  %s612_s19 = smov [#allocation8]  }
  0x3c   :  { %v430_v26 = vpack.c.bf16 %v188_v25, %v187_v24  ;;  %v190_v28 = vld [vmem:[#allocation5 + $0x28] sm:$0xff]  ;;  %v191_v34 = vld [vmem:[#allocation5 + $0x30] sm:$0xff]  ;;  %v192_v35 = vld [vmem:[#allocation5 + $0x38] sm:$0xff]  ;;  %s324_s20 = sshll.u32 %s612_s19, 4  ;;  %s325_s20 = int_to_ptr.vmem [resolvable:$true] %s324_s20 }
  0x3d   :  { %v81_v29 = vmax.f32 %v78_v15, %v80_v21  ;;  %v88_v30 = vmax.f32 %v85_v17, %v87_v22  ;;  %427 = vmatprep.subr.bf16.mxu1 %v426_v23  ;;  %v434_v33 = vpack.c.bf16 %v190_v28, %v189_v27  ;;  %v438_v36 = vpack.c.bf16 %v192_v35, %v191_v34  ;;  %v193_v37 = vld [vmem:[#allocation5 + $0x40] sm:$0xff]  ;;  %v194_v38 = vld [vmem:[#allocation5 + $0x48] sm:$0xff]  ;;  %v102_v47 = vld [vmem:[#allocation2 + $0x8] sm:$0xff] }
  0x3e   :  { %429 = vmatpush3.bf16.msra.mxu1 %v426_v23  ;;  %v442_v39 = vpack.c.bf16 %v194_v38, %v193_v37  ;;  %v375_v51 = vld [vmem:[%s774_s2] ss:$0 sm:$0xff]  ;;  %s611_s2 = smov [#allocation9]  }
  0x3f   :  { %v366_v31 = vmul.f32 -1.442695, %v81_v29  ;;  %v367_v32 = vmul.f32 -1.442695, %v88_v30  ;;  %431 = vmatprep.subr.bf16.mxu1 %v430_v26  ;;  %v374_v52 = vld [vmem:[%s775_s3] ss:$0 sm:$0xff] }
  0x40   :  { %s336_s3 = sshll.u32 %s611_s2, 4  ;;  %s337_s3 = int_to_ptr.vmem [resolvable:$true] %s336_s3 }
  0x41   :  { %457 = vpow2.f32 %v366_v31  ;;  %s531_s21 = scalar_lea.vmem %s337_s3, 256  ;;  %p536_p11 = scmp.lt.s32.totalorder %s337_s3, %s337_s3 }
  0x42   :  { %459 = vpow2.f32 %v367_v32  ;;  %433 = vmatpush3.bf16.msra.mxu1 %v430_v26  ;;  %p532_p10 = scmp.ne.s32.totalorder %s337_s3, %s531_s21  ;;  %p537_p12 = scmp.lt.s32.totalorder %s531_s21, %s531_s21 }
  0x43   :  { %435 = vmatprep.subr.bf16.mxu1 %v434_v33 }
  0x44   :  { %p538_p13 = por %p537_p12, %p536_p11 }
  0x46   :  { %437 = vmatpush3.bf16.msra.mxu1 %v434_v33  ;;  %p539_p0 = pnand %p538_p13, %p532_p10 }
  0x47   :  { %439 = vmatprep.subr.bf16.mxu1 %v438_v36 }
  0x4a   :  { %441 = vmatpush3.bf16.msra.mxu1 %v438_v36 }
  0x4b   :  { %v458_v40 = vpop.eup %457  ;;  %443 = vmatprep.subr.bf16.mxu1 %v442_v39 }
  0x4c   :  { %v460_v41 = vpop.eup %459  ;;  %v95_v42 = vadd.f32 1.0, %v458_v40 }
  0x4d   :  { %v96_v43 = vadd.f32 1.0, %v460_v41 }
  0x4e   :  { %461 = vrcp.f32 %v95_v42  ;;  %445 = vmatpush3.bf16.msra.mxu1 %v442_v39 }
  0x4f   :  { %463 = vrcp.f32 %v96_v43 }
  0x58   :  { %v462_v44 = vpop.eup %461 }
  0x59   :  { %v464_v45 = vpop.eup %463 }
  0x5a   :  { %v422_v46 = vpack.c.bf16 %v464_v45, %v462_v44 }
  0x5c   :  { %423 = vmatprep.subr.bf16.mxu0 %v422_v46 }
  0x5d   :  { %425 = vmatpush3.bf16.msra.mxu0 %v422_v46 }
  0x60   :  { %397 = vmatmul.mubr.msk.f32.vlgmr.msra.gmra.mrb[0].mxu0 %vm103_vm1, %v102_v47 }
 0x133   :  { %v398_v48 = vpop.f32.mrb[0].mxu0 }
 0x134   :  { %v176_v49 = vpop.f32.mrb[1].mxu0 }
 0x135   :  { %419 = vmatprep.mubr.msk.f32.mxu1 %vm74_vm0, %v176_v49 }
 0x136   :  { %420 = vmatmul.mubr.msk.f32.vlgmr.msra.gmra.mrb[0].mxu1 %vm74_vm0, %v398_v48 }
 0x209   :  { %v421_v50 = vpop.f32.mrb[0].mxu1 }
 0x20a   :  { %vm277_vm2 = vcmp.gt.f32.partialorder %v421_v50, 0.6  ;;  %v267_v53 = vpop.f32.mrb[1].mxu1 }
 0x20b   :  { %v373_v55 = vsel %vm277_vm2, 1.0, %v610_v54  ;;  %vm276_vm3 = vcmp.gt.f32.partialorder %v267_v53, 0.6 }
 0x20c   :  { %v316_v56 = vmax.f32 %v373_v55, %v375_v51  ;;  %283 = vst.msk [vmem:[#allocation9 + $0x8] sm:$0xff] %vm103_vm1, %v373_v55  ;;  %v372_v57 = vsel %vm276_vm3, 1.0, %v610_v54  ;;  %v292_v58 = vmul.f32 %v374_v52, %v373_v55 }
 0x20d   :  { %282 = vst.msk [vmem:[#allocation9] sm:$0xff] %vm103_vm1, %v372_v57  ;;  %v315_v59 = vmax.f32 %v372_v57, %v375_v51  ;;  %v291_v60 = vmul.f32 %v374_v52, %v372_v57 }
 0x20e   :  { %318 = vst.msk [vmem:[#allocation8 + $0x8] sm:$0xff] %vm74_vm0, %v316_v56  ;;  %v294_v61 = vsel %vm74_vm0, %v292_v58, 0.0 }
 0x20f   :  { %317 = vst.msk [vmem:[#allocation8] sm:$0xff] %vm74_vm0, %v315_v59  ;;  %v293_v62 = vsel %vm74_vm0, %v291_v60, 0.0 }
 0x210   :  { %v295_v63 = vadd.f32 %v294_v61, %v293_v62 }
 0x212   :  { %296 = vadd.xlane.f32.xlu0 %v295_v63 }
 0x213   :  { %542 = shalt.err (!%p539_p0)
}
 0x214   :  { %s543_s24 = scalar_lea.hbm %s778_s6, 256 }
 0x215   :  { %p544_p1 = scmp.ne.s32.totalorder %s778_s6, %s543_s24  ;;  %p547_p2 = scmp.lt.u32.totalorder %s543_s24, %s778_s6 }
 0x217   :  { %p549_p3 = pnand %p547_p2, %p544_p1 }
 0x219   :  { %552 = shalt.err (!%p549_p3)
}
 0x21a   :  { %342 = dma.vmem_to_hbm [thread:$0]  %s337_s3, 256, %s778_s6, [#allocation10], %s607_s13, %s607_s13, %s608_s14  }
 0x21b   :  { %s553_s8 = scalar_lea.vmem %s325_s20, 256  ;;  %p558_p5 = scmp.lt.s32.totalorder %s325_s20, %s325_s20 }
 0x21c   :  { %p554_p4 = scmp.ne.s32.totalorder %s325_s20, %s553_s8  ;;  %p559_p6 = scmp.lt.s32.totalorder %s553_s8, %s553_s8 }
 0x21e   :  { %p560_p7 = por %p559_p6, %p558_p5 }
 0x220   :  { %p561_p8 = pnand %p560_p7, %p554_p4 }
 0x222   :  { %564 = shalt.err (!%p561_p8)
}
 0x223   :  { %s565_s11 = scalar_lea.hbm %s777_s5, 256 }
 0x224   :  { %p566_p9 = scmp.ne.s32.totalorder %s777_s5, %s565_s11  ;;  %p569_p10 = scmp.lt.u32.totalorder %s565_s11, %s777_s5 }
 0x226   :  { %p571_p11 = pnand %p569_p10, %p566_p9 }
 0x228   :  { %574 = shalt.err (!%p571_p11)
}
 0x229   :  { %330 = dma.vmem_to_hbm [thread:$0]  %s325_s20, 256, %s777_s5, [#allocation4], %s607_s13, %s607_s13, %s608_s14   ;;  %vm306_vm4 = vcmask 0  }
 0x22a   :  { %s613_s16 = smov [#allocation11]  }
 0x22b   :  { %s349_s17 = sshll.u32 %s613_s16, 4  ;;  %s350_s17 = int_to_ptr.vmem [resolvable:$true] %s349_s17 }
 0x22c   :  { %s575_s2 = scalar_lea.vmem %s350_s17, 16  ;;  %s579_s3 = scalar_lea.vmem %s350_s17, 32 }
 0x22d   :  { %p576_p12 = scmp.ne.s32.totalorder %s350_s17, %s575_s2  ;;  %p580_p13 = scmp.lt.s32.totalorder %s350_s17, %s350_s17 }
 0x22e   :  { %p581_p0 = scmp.lt.s32.totalorder %s579_s3, %s575_s2 }
 0x230   :  { %p582_p1 = por %p581_p0, %p580_p13 }
 0x232   :  { %p583_p2 = pnand %p582_p1, %p576_p12 }
 0x29f   :  { %v297_v0 = vpop.xlane.xlu0 %296 }
 0x2a0   :  { %v298_v1 = vrot.slane %v297_v0, 4 }
 0x2a2   :  { %v299_v2 = vadd.f32 %v298_v1, %v297_v0 }
 0x2a4   :  { %v300_v3 = vrot.slane %v299_v2, 2 }
 0x2a6   :  { %v301_v4 = vadd.f32 %v300_v3, %v299_v2 }
 0x2a8   :  { %v302_v5 = vrot.slane %v301_v4, 1 }
 0x2aa   :  { %v303_v6 = vadd.f32 %v302_v5, %v301_v4 }
 0x2ac   :  { %446 = vpush %v303_v6 }
 0x2dd   :  { %s447_s18 = spop %446 }
 0x2de   :  { %v305_v7 = vstv %s447_s18 }
 0x2df   :  { %307 = vst.msk [vmem:[#allocation11] sm:$0x1] %vm306_vm4, %v305_v7 }
 0x2e0   :  { %586 = shalt.err (!%p583_p2)
}
 0x2e1   :  { %s587_s14 = scalar_lea.hbm %s779_s7, 16 }
 0x2e2   :  { %p588_p3 = scmp.ne.s32.totalorder %s779_s7, %s587_s14  ;;  %p591_p4 = scmp.lt.u32.totalorder %s587_s14, %s779_s7 }
 0x2e4   :  { %p593_p5 = pnand %p591_p4, %p588_p3 }
 0x2e6   :  { %596 = shalt.err (!%p593_p5)
}
 0x2e7   :  { %352 = dma.vmem_to_hbm [thread:$0]  %s350_s17, 16, %s779_s7, [#allocation10]  }
 0x2e8   :  { %601 = dma.done.wait [#allocation4], 256  }
 0x2e9   :  { %602 = vsyncadd [#allocation4], 4294967040 }
 0x2ea   :  { %603 = dma.done.wait [#allocation10], 272  }
 0x2eb   :  { %604 = vsyncadd [#allocation10], 4294967024 }
 0x2ec   :  { %362 = vsyncpa [#allocation3], 1 }
 0x2ed   :  { %363 = vsyncpa [#allocation6], 1 }
 0x2ee   :  { %364 = vsyncpa [#allocation4], 1 }
 0x2ef   :  { %365 = vsyncpa [#allocation10], 1 }

</bundles_post_ra>
